<compile_context>
chip_gen: v7x
topology: tpu7x:2x2x1
jax: 0.10.0
libtpu: 0.0.40
codegen_flags: <defaults>
</compile_context>

<pallas_src>
import functools
import math

import jax
import jax.numpy as jnp
from jax import lax
from jax.experimental import pallas as pl
from jax.experimental.pallas import tpu as pltpu


# ---------------------------------------------------------------------------
# Primary path: HBM -> HBM strided DMA (no reshape, no VMEM staging).
# ---------------------------------------------------------------------------


def _dma_kernel(x_hbm, o_hbm, sems, *, factor, rows, num_i, num_chunks, ring):
    """Copies every `factor`-th sequence row straight HBM -> HBM.

    Work is split into `num_chunks = N * num_i` equal chunks of `rows` output
    rows each; up to `ring` DMAs are kept in flight via a semaphore ring.
    """

    def chunk_copy(t):
        b = t // num_i
        i = t % num_i
        return pltpu.make_async_copy(
            x_hbm.at[b, pl.ds(i * rows * factor, rows, stride=factor), :],
            o_hbm.at[b, pl.ds(i * rows, rows), :],
            sems.at[t % ring],
        )

    def body(t, carry):
        @pl.when(t >= ring)
        def _():
            # Same semaphore slot and same (static) transfer size as the DMA
            # issued `ring` iterations ago -> waits for exactly that DMA.
            chunk_copy(t).wait()

        chunk_copy(t).start()
        return carry

    lax.fori_loop(0, num_chunks, body, None)

    # Drain the DMAs still in flight (static trip count; all sizes equal).
    tail = min(ring, num_chunks)
    for k in range(tail):
        chunk_copy(num_chunks - tail + k).wait()


def _pick_dma_chunk_rows(s_out, e, itemsize):
    """Output rows per DMA chunk: ~2 MiB each, dividing s_out exactly."""
    target = max(8, (2 << 20) // max(1, e * itemsize))
    if s_out <= target:
        return s_out
    best = 1
    for d in range(1, math.isqrt(s_out) + 1):
        if s_out % d == 0:
            for c in (d, s_out // d):
                if c <= target and c > best:
                    best = c
    # No useful divisor (e.g. prime s_out): one big strided DMA per batch item
    # beats thousands of tiny, descriptor-bound ones.
    if best * e * itemsize < (256 << 10) and s_out * e * itemsize > (2 << 20):
        return s_out
    return best


def _downsample_dma(x, factor):
    n, s, e = x.shape
    s_out = s // factor
    itemsize = jnp.dtype(x.dtype).itemsize
    rows = _pick_dma_chunk_rows(s_out, e, itemsize)
    num_i = s_out // rows
    num_chunks = n * num_i
    ring = max(1, min(8, num_chunks))
    kernel = functools.partial(
        _dma_kernel, factor=factor, rows=rows, num_i=num_i,
        num_chunks=num_chunks, ring=ring)
    return pl.pallas_call(
        kernel,
        out_shape=jax.ShapeDtypeStruct((n, s_out, e), x.dtype),
        in_specs=[pl.BlockSpec(memory_space=pl.ANY)],
        out_specs=pl.BlockSpec(memory_space=pl.ANY),
        scratch_shapes=[pltpu.SemaphoreType.DMA((ring,))],
        compiler_params=pltpu.CompilerParams(has_side_effects=True),
    )(x)


# ---------------------------------------------------------------------------
# Fallback path: BlockSpec-pipelined contiguous read + strided VMEM select.
# ---------------------------------------------------------------------------


def _fallback_kernel(x_ref, o_ref, *, rows, factor):
    # Contiguous rows were DMA'd by the BlockSpec pipeline (factor-x read
    # amplification); select every factor-th row with a strided VMEM load and
    # store a dense output block.
    o_ref[...] = x_ref[pl.ds(0, rows, stride=factor), :]


def _pick_fallback_rows(s_out, e, itemsize, factor, n):
    sublane = max(8, 32 // itemsize)          # 8 f32 / 16 bf16 / 32 int8
    if s_out <= sublane:
        return s_out
    # Factor-aware VMEM budget: 2x input blocks (rows*factor) + 2x output
    # blocks (rows) must fit the *default* scoped VMEM on every generation
    # (16 MiB v5e, 32 MiB v6e/v7x; v7x has only 64 MiB physical VMEM).
    budget = 12 << 20
    rows = budget // max(1, 2 * e * itemsize * (factor + 1))
    rows = max(sublane, min(rows, s_out))
    rows = max(sublane, (rows // sublane) * sublane)
    # v7x megacore: keep at least ~4 grid steps so both TensorCores get work.
    while n * pl.cdiv(s_out, rows) < 4 and rows > sublane:
        rows = max(sublane, ((rows // 2) // sublane) * sublane)
    # Prefer a row count that divides s_out exactly (no ragged edge block).
    cand = rows
    while cand >= sublane and s_out % cand != 0:
        cand -= sublane
    if cand >= sublane:
        rows = cand
    return rows


def _downsample_blockspec(x, factor):
    n, s, e = x.shape
    s_out = s // factor
    itemsize = jnp.dtype(x.dtype).itemsize
    rows = _pick_fallback_rows(s_out, e, itemsize, factor, n)
    grid = (n, pl.cdiv(s_out, rows))
    kernel = functools.partial(_fallback_kernel, rows=rows, factor=factor)
    # TODO(synk): fold the batch axis into the block for large-N / small-S
    # shapes, and add an E grid axis for extreme feature dims.
    return pl.pallas_call(
        kernel,
        out_shape=jax.ShapeDtypeStruct((n, s_out, e), x.dtype),
        grid_spec=pltpu.PrefetchScalarGridSpec(
            num_scalar_prefetch=0,
            grid=grid,
            in_specs=[pl.BlockSpec((None, rows * factor, e),
                                   lambda b, i: (b, i, 0))],
            out_specs=pl.BlockSpec((None, rows, e), lambda b, i: (b, i, 0)),
        ),
        compiler_params=pltpu.CompilerParams(
            dimension_semantics=("parallel", "parallel")),
    )(x)


# ---------------------------------------------------------------------------
# Public wrapper.
# ---------------------------------------------------------------------------

_STRIDED_DMA_BROKEN = False  # flipped if Mosaic rejects strided DMA source slices


def downsample(x: jnp.ndarray, downsample_factor: int) -> jnp.ndarray:
    """Pallas equivalent of DownSampling(downsample_factor)(x)."""
    global _STRIDED_DMA_BROKEN
    assert x.ndim == 3, f"Input tensor must have 3 dimensions, but got {x.ndim}."
    n, s, e = x.shape
    factor = int(downsample_factor)
    assert s % factor == 0, (
        f"Input tensor sequence length must be divisible by the downsample "
        f"factor, but got {s} % {factor} != 0."
    )
    if factor == 1:
        return x                        # no-op: skip 2*N*S*E of copy traffic
    s_out = s // factor
    if n == 0 or s_out == 0 or e == 0:
        return x[:, ::factor, :]        # degenerate sizes: nothing to move
    itemsize = jnp.dtype(x.dtype).itemsize
    # Strided HBM reads burst only ~min(E,128)*itemsize contiguous bytes; for
    # very short bursts at small factors a contiguous (factor+1)/2-x read is
    # competitive, so gate the strided-DMA path (review heuristic).
    use_strided = (e * itemsize >= 512) or (factor >= 4)
    if use_strided and not _STRIDED_DMA_BROKEN:
        try:
            return _downsample_dma(x, factor)
        except Exception:
            # This Mosaic build does not lower strided DMA source slices
            # (only detectable at compile time of an eager call); remember and
            # use the contiguous-read fallback from now on.
            _STRIDED_DMA_BROKEN = True
    return _downsample_blockspec(x, factor)


if __name__ == "__main__":
    key = jax.random.PRNGKey(0)
    tests = [
        ((2, 8, 128), 2),     # small (N, S, E), factor 2
        ((2, 32, 128), 4),    # factor 4, exercises the factor>=4 gate as well
    ]
    for shape, factor in tests:
        key, sub = jax.random.split(key)
        x = jax.random.normal(sub, shape, dtype=jnp.float32)
        out = jax.block_until_ready(downsample(x, factor))
        ref = x[:, ::factor, :]
        assert out.shape == ref.shape, (out.shape, ref.shape)
        assert out.dtype == x.dtype
        assert jnp.array_equal(out, ref), (
            f"Pallas downsample mismatch vs reference for {shape}, factor={factor}"
        )
    print("KERNEL_OK")
</pallas_src>

<mosaic_0001>
module attributes {stable_mosaic.version = 11 : i64} {
  func.func @_fallback_kernel(%arg0: i32, %arg1: i32, %arg2: memref<1x8x128xf32, #tpu.memory_space<vmem>>, %arg3: memref<1x4x128xf32, #tpu.memory_space<vmem>>) attributes {dimension_semantics = [#tpu.dimension_semantics<parallel>, #tpu.dimension_semantics<parallel>], iteration_bounds = array<i64: 2, 1>, scalar_prefetch = 0 : i64, scratch_operands = 0 : i64, tpu.core_type = #tpu.core_type<tc>, window_params = [{transform_indices = @transform_0, window_bounds = array<i64: 1, 8, 128>}, {transform_indices = @transform_1, window_bounds = array<i64: 1, 4, 128>}]} {
    %c0 = arith.constant 0 : index
    %c0_0 = arith.constant 0 : index
    %c0_1 = arith.constant 0 : index
    %0 = tpu.strided_load %arg2[%c0, %c0_0, %c0_1] {strides = array<i32: 1, 2, 1>} : memref<1x8x128xf32, #tpu.memory_space<vmem>>, vector<1x4x128xf32>
    %1 = vector.shape_cast %0 : vector<1x4x128xf32> to vector<4x128xf32>
    %c0_2 = arith.constant 0 : index
    %c0_3 = arith.constant 0 : index
    %c0_4 = arith.constant 0 : index
    %2 = vector.load %arg3[%c0_2, %c0_3, %c0_4] : memref<1x4x128xf32, #tpu.memory_space<vmem>>, vector<1x4x128xf32>
    %3 = vector.shape_cast %2 : vector<1x4x128xf32> to vector<4x128xf32>
    %4 = vector.shape_cast %1 : vector<4x128xf32> to vector<1x4x128xf32>
    tpu.vector_store %arg3[%c0_2, %c0_3, %c0_4], %4 {strides = array<i32>} : memref<1x4x128xf32, #tpu.memory_space<vmem>>, vector<1x4x128xf32>,
    return
  }
  func.func @transform_0(%arg0: i32, %arg1: i32) -> (i32, i32, i32) {
    %c0_i32 = arith.constant 0 : i32
    %c0_i32_0 = arith.constant 0 : i32
    return %arg0, %arg1, %c0_i32 : i32, i32, i32
  }
  func.func @transform_1(%arg0: i32, %arg1: i32) -> (i32, i32, i32) {
    %c0_i32 = arith.constant 0 : i32
    %c0_i32_0 = arith.constant 0 : i32
    return %arg0, %arg1, %c0_i32 : i32, i32, i32
  }
}

</mosaic_0001>

<bundles_post_ra>
// kernel: tpu_custom_call.1
= control target key start
LH: loop header
LB: loop body
LE: loop exit
PB: predicated region body
PF: predicated region fallthrough
CT: control target
= control target key end

     0   :  { %6 = vsyncpa [#allocation3], 0  ;;  %s620_s0 = inlined_call_operand.hbm [shape: f32[2,8,128], index: 0, kind: input, shape index: {}]   ;;  %s621_s1 = inlined_call_operand.hbm [shape: f32[2,4,128], index: 1, kind: output, shape index: {}]  }
   0x1   :  { %8 = vsyncpa [#allocation3 + $0x1], 0 }
   0x2   :  { %9 = vsyncpa [#allocation4], 0 }
   0x3   :  { %11 = vsyncpa [#allocation4 + $0x1], 0  ;;  %s447_s6 = smov 0   ;;  %s449_s7 = smov 0  }
   0x4   :  { %s451_s8 = smov 0   ;;  %s453_s9 = smov 0  }
   0x5   :  { %s455_s10 = smov 0   ;;  %s457_s11 = smov 0  }
   0x6 LB: > { %s246_s12 = sadd.s32 4294967295, %s433_s11   ;;  %s247_s13 = sadd.s32 4294967294, %s433_s11   ;;  %s433_s11 = sphi %s457_s11, %s17_s11   ;;  %s429_s10 = sphi %s455_s10, %s637_s10   ;;  %s425_s9 = sphi %s453_s9, %s636_s9   ;;  %s421_s8 = sphi %s451_s8, %s635_s8   ;;  %s417_s7 = sphi %s449_s7, %s634_s7   ;;  %s413_s6 = sphi %s447_s6, %s633_s6  }
   0x7   : > { %s29_s14 = sadd.s32 1, %s429_s10  ;;  %s38_s15 = sadd.s32 1, %s421_s8 }
   0x8   : > { %p31_p0 = scmp.ge.s32.totalorder %s29_s14, 2  ;;  %p45_p1 = scmp.ne.s32.totalorder %s421_s8, %s417_s7 }
   0x9   : > { %p46_p2 = scmp.eq.s32.totalorder %s433_s11, 0  ;;  %p51_p3 = scmp.ne.s32.totalorder %s417_s7, %s413_s6 }
   0xa   : > { %s639_s14 = smov (%p31_p0, %s29_s14), 0  ;;  %p52_p5 = scmp.eq.s32.totalorder %s246_s12, 0 }
   0xb   : > { %p488_p4 = por %p46_p2, %p45_p1  ;;  %s33_s17 = ssub.s32 %s429_s10, %s639_s14 }
   0xc   : > { %p77_p6 = scmp.eq.s32.totalorder %s246_s12, 1  ;;  %p36_p7 = scmp.eq.s32.totalorder %s33_s17, 0 }
   0xd   : > { %p494_p8 = por %p52_p5, %p51_p3  ;;  %p83_p10 = scmp.eq.s32.totalorder %s247_s13, 1 }
   0xe   : > { %p498_p9 = por %p77_p6, %p45_p1  ;;  %p271_p13 = scmp.lt.s32.totalorder %s433_s11, 2 }
   0xf   : > { %s503_s20 = scalar_select %p36_p7, %s421_s8, %s38_s15  }
  0x10   : > { %s625_s19 = scalar_select %p498_p9, 1, 0 }
  0x11   : > { %p505_p11 = por %p83_p10, %p51_p3  ;;  %s103_s22 = sand.u32 1, %s421_s8  }
  0x12   : > { %s250_s23 = sshll.u32 %s103_s22, 3  ;;  %s251_s24 = sshll.u32 %s429_s10, 7 }
  0x13   : > { %s626_s21 = scalar_select %p505_p11, 1, 0 }
  0x14   : > { %s516_s27 = scalar_lea.hbm %s620_s0, %s251_s24  ;;  %s107_s28 = scalar_lea.vmem [#allocation2], %s250_s23 }
  0x15   : > { %s115_s29 = sshll.u32 %s107_s28, 4  ;;  %p522_p0 = pnand %p271_p13, %p488_p4  ;;  %s518_s29 = int_to_ptr.vmem [resolvable:$true] %s115_s29 }
  0x16   : > { %s104_s2 = scalar_lea.sflag [#allocation3], %s103_s22  ;;  %s321_s3 = scalar_lea.hbm %s516_s27, 128 }
  0x17   : > { %p322_p3 = scmp.ne.s32.totalorder %s516_s27, %s321_s3  ;;  %p323_p5 = pneg %p522_p0 }
  0x18   : > { %s326_s12 = scalar_lea.hbm %s620_s0, 256  ;;  %p327_p4 = scmp.lt.u32.totalorder %s516_s27, %s620_s0 }
  0x19   : > { %p324_p6 = pnand %p323_p5, %p322_p3  ;;  %p328_p10 = scmp.lt.u32.totalorder %s326_s12, %s321_s3 }
  0x1a   : > { %p330_p12 = scmp.lt.u32.totalorder %s321_s3, %s516_s27 }
  0x1b   : > { %p325_p7 = pneg %p324_p6  ;;  %p329_p13 = por %p328_p10, %p327_p4 }
  0x1d   : > { %p331_p1 = por %p330_p12, %p329_p13 }
  0x1f   : > { %p332_p2 = pnand %p331_p1, %p325_p7 }
  0x21   : > { %335 = shalt.err (!%p332_p2)
}
  0x22   : > { %s336_s16 = scalar_lea.vmem %s518_s29, 128  ;;  %s435_s17 = smov [#allocation2]  }
  0x23   : > { %p337_p3 = scmp.ne.s32.totalorder %s518_s29, %s336_s16  ;;  %s341_s22 = sshll.u32 %s435_s17, 4  ;;  %s342_s22 = int_to_ptr.vmem [resolvable:$false] %s341_s22 }
  0x24   : > { %s343_s23 = scalar_lea.vmem %s342_s22, 256  ;;  %p344_p9 = scmp.lt.s32.totalorder %s518_s29, %s342_s22 }
  0x25   : > { %p339_p6 = pnand %p337_p3, %p323_p5  ;;  %p345_p4 = scmp.lt.s32.totalorder %s343_s23, %s336_s16 }
  0x27   : > { %p340_p11 = pneg %p339_p6  ;;  %p346_p10 = por %p345_p4, %p344_p9 }
  0x29   : > { %p347_p12 = pnand %p346_p10, %p340_p11 }
  0x2b   : > { %350 = shalt.err (!%p347_p12)
}
  0x2c   : > { %266 = dma.hbm_to_vmem [thread:$0]  (!%p522_p0), %s516_s27, 128, %s518_s29, %s104_s2  }
  0x2d   : > { %p628_p1 = scmp.lt.s32.totalorder %s433_s11, 3  ;;  %p629_p2 = scmp.ge.s32.totalorder %s433_s11, 1 }
  0x2f   : > { %p121_p5 = pnand %p629_p2, %p628_p1 }
  0x30   : > { %s558_s24 = sand.u32 (!%p121_p5), 1, %s417_s7  }
  0x31   : > { %124 = sbr.rel (%p121_p5) target bundleno = 83 (0x53), region = 24  ;;  %s253_s25 = sshll.u32 (!%p121_p5), %s558_s24, 3 }
  0x32   : > { %s127_s26 = scalar_lea.sflag (!%p121_p5), [#allocation3], %s558_s24  ;;  %s130_s28 = scalar_lea.vmem (!%p121_p5), [#allocation2], %s253_s25 }
  0x38   : > { %404 = dma.done.wait (%p494_p8), %s127_s26, 128  }
  0x39   : > { %406 = vsyncadd (%p494_p8), %s127_s26, 4294967168  ;;  %s254_s27 = sshll.u32 %s558_s24, 2  ;;  %s256_s2 = sshll.u32 %s425_s9, 6  ;;  %v149_v0 = vld [vmem:[%s130_s28] ss:$2 sm:$0xf] }
  0x3a   : > { %s148_s29 = scalar_lea.vmem [#allocation5], %s254_s27  ;;  %s573_s5 = scalar_lea.hbm %s621_s1, %s256_s2 }
  0x3b   : > { %s166_s30 = sshll.u32 %s148_s29, 4  ;;  %150 = vst [vmem:[%s148_s29] sm:$0xf] %v149_v0  ;;  %s152_s18 = scalar_lea.sflag [#allocation4], %s558_s24  ;;  %s568_s30 = int_to_ptr.vmem [resolvable:$true] %s166_s30 }
  0x3c   : > { %s351_s12 = scalar_lea.vmem %s568_s30, 64  ;;  %p630_p9 = scmp.ne.s32.totalorder %s625_s19, 0 }
  0x3d   : > { %p352_p8 = scmp.ne.s32.totalorder %s568_s30, %s351_s12  ;;  %s436_s13 = smov [#allocation5]  }
  0x3e   : > { %s355_s9 = sshll.u32 %s436_s13, 4  ;;  %s356_s9 = int_to_ptr.vmem [resolvable:$false] %s355_s9 }
  0x3f   : > { %p353_p11 = pnand %p352_p8, %p630_p9  ;;  %s357_s15 = scalar_lea.vmem %s356_s9, 128 }
  0x40   : > { %p358_p7 = scmp.lt.s32.totalorder %s568_s30, %s356_s9  ;;  %p359_p13 = scmp.lt.s32.totalorder %s357_s15, %s351_s12 }
  0x41   : > { %p354_p0 = pneg %p353_p11 }
  0x42   : > { %p360_p3 = por %p359_p13, %p358_p7 }
  0x44   : > { %p361_p6 = pnand %p360_p3, %p354_p0 }
  0x46   : > { %364 = shalt.err (!%p361_p6)
}
  0x47   : > { %s365_s16 = scalar_lea.hbm %s573_s5, 64  ;;  %s369_s23 = scalar_lea.hbm %s621_s1, 128 }
  0x48   : > { %p366_p4 = scmp.ne.s32.totalorder %s573_s5, %s365_s16  ;;  %p370_p1 = scmp.lt.u32.totalorder %s573_s5, %s621_s1 }
  0x49   : > { %p371_p2 = scmp.lt.u32.totalorder %s369_s23, %s365_s16  ;;  %p373_p8 = scmp.lt.u32.totalorder %s365_s16, %s573_s5 }
  0x4a   : > { %p367_p10 = pnand %p366_p4, %p630_p9 }
  0x4b   : > { %p372_p5 = por %p371_p2, %p370_p1 }
  0x4c   : > { %p368_p12 = pneg %p367_p10 }
  0x4d   : > { %p374_p11 = por %p373_p8, %p372_p5 }
  0x4f   : > { %p375_p0 = pnand %p374_p11, %p368_p12 }
  0x51   : > { %378 = shalt.err (!%p375_p0)
}
  0x52   : > { %261 = dma.vmem_to_hbm [thread:$0]  (%p630_p9), %s568_s30, 64, %s573_s5, %s152_s18  }
  0x53 PF: > { %s178_s26 = sand.u32 1, %s413_s6   ;;  %p631_p7 = scmp.ne.s32.totalorder %s626_s21, 0 }
  0x54   : > { %p632_p13 = scmp.ge.s32.totalorder %s433_s11, 2  ;;  %s179_s28 = scalar_lea.sflag [#allocation4], %s178_s26 }
  0x56   : > { %p268_p3 = pnand %p632_p13, %p631_p7 }
  0x58   : > { %408 = dma.done.wait (!%p268_p3), %s179_s28, 64  }
  0x59   : > { %410 = vsyncadd (!%p268_p3), %s179_s28, 4294967232  ;;  %s17_s11 = sadd.s32 1, %s433_s11   ;;  %s633_s6 = smov %s417_s7 }
  0x5a   : > { %p14_p6 = scmp.ge.s32.totalorder %s17_s11, 4   ;;  %s634_s7 = smov %s421_s8 }
  0x5b   : > { %s635_s8 = smov %s503_s20  ;;  %s636_s9 = smov %s429_s10 }
  0x5c   : > { %s637_s10 = smov %s639_s14  ;;  %16 = sbr.rel (!%p14_p6) target bundleno = 6 (0x6), region = 69 }
  0x63   :  { %184 = vsyncpa [#allocation3], 1 }
  0x64   :  { %186 = vsyncpa [#allocation3 + $0x1], 1 }
  0x65   :  { %187 = vsyncpa [#allocation4], 1 }
  0x66   :  { %189 = vsyncpa [#allocation4 + $0x1], 1 }

</bundles_post_ra>
